<compile_context>
chip_gen: v6e
topology: v6e:2x2x1
jax: 0.10.0
libtpu: 0.0.40
codegen_flags: <defaults>
</compile_context>

<pallas_src>
import functools

import jax
import jax.numpy as jnp
from jax import lax
from jax.experimental import pallas as pl
from jax.experimental.pallas import tpu as pltpu


def _round_up(n, m):
    return ((n + m - 1) // m) * m


# ----------------------------------------------------------------------------
# Kernel: full HyperbolicCube (all layers) over one column tile of x^T
# ----------------------------------------------------------------------------
def _cube_fused_kernel(*refs, num_layers, curvature, ln_eps, ball_eps):
    """refs = (xT_ref, [w, b, gamma, beta] * num_layers, oT_ref).

    Activations are kept transposed: [features, rows_tile] (rows on lanes).
    Each layer: Linear -> ReLU -> LayerNorm -> PoincareBall(c).expmap0
    (with geoopt's project=True ball clipping).
    """
    xT_ref = refs[0]
    oT_ref = refs[-1]
    p_refs = refs[1:-1]

    unit_c = float(curvature) == 1.0
    sqrt_c = float(curvature) ** 0.5
    inv_sqrt_c = 1.0 / sqrt_c

    h = xT_ref[...].astype(jnp.float32)                      # [D0, tile]

    for l in range(num_layers):                              # unrolled
        w_ref, b_ref, g_ref, bt_ref = p_refs[4 * l: 4 * l + 4]

        # 1) Euclidean projection (nn.Linear) on the MXU:
        #    yT[Dout, tile] = W[Dout, Din] @ hT[Din, tile] + b[Dout, 1]
        y = jnp.dot(w_ref[...].astype(jnp.float32), h,
                    preferred_element_type=jnp.float32)
        y = y + b_ref[...].astype(jnp.float32)

        # 2) ReLU.
        y = jnp.maximum(y, 0.0)

        # 3) LayerNorm over features: sublane reductions -> lane-dense [1,tile]
        #    per-row stats (one-pass sum / sum-of-squares, fine in f32).
        d_out = y.shape[0]
        inv_d = jnp.float32(1.0 / d_out)
        s1 = jnp.sum(y, axis=0, keepdims=True)               # [1, tile]
        s2 = jnp.sum(y * y, axis=0, keepdims=True)           # [1, tile]
        mean = s1 * inv_d
        var = jnp.maximum(s2 * inv_d - mean * mean, 0.0)
        y = (y - mean) * lax.rsqrt(var + jnp.float32(ln_eps))
        y = y * g_ref[...].astype(jnp.float32) + bt_ref[...].astype(jnp.float32)

        # 4) PoincareBall(c).expmap0 with project=True.
        #    expmap0(u) = tanh(sqrt(c)|u|) * u / (sqrt(c)|u|); its norm equals
        #    tanh(sqrt(c)|u|)/sqrt(c), so clipping to the ball of radius
        #    (1 - eps)/sqrt(c) is exactly a min() on the tanh factor -- one
        #    lane-dense sublane reduction, no divides (rsqrt/tanh on EUP).
        ss = jnp.maximum(jnp.sum(y * y, axis=0, keepdims=True),
                         jnp.float32(1e-30))   # == geoopt clamp |u| @ 1e-15
        inv_norm = lax.rsqrt(ss)                              # [1, tile]
        norm = ss * inv_norm
        arg = norm if unit_c else jnp.float32(sqrt_c) * norm
        t = jnp.minimum(jnp.tanh(arg), jnp.float32(1.0 - ball_eps))
        scale = t * inv_norm
        if not unit_c:
            scale = scale * jnp.float32(inv_sqrt_c)
        h = y * scale                                         # [Dout, tile]

    oT_ref[...] = h.astype(oT_ref.dtype)


# ----------------------------------------------------------------------------
# Wrapper
# ----------------------------------------------------------------------------
def hyperbolic_cube_forward(x, params, *, curvature=1.0, ln_eps=1e-5,
                            ball_eps=4e-3, max_tile_cols=8192,
                            min_grid_steps=8):
    """
    x: [batch, seq, layers_dims[0]]
    params: list of dicts with keys 'w' [Dout, Din] (torch nn.Linear layout),
            'b' [Dout, 1], 'gamma' [Dout, 1], 'beta' [Dout, 1]
            (dropout p=0 -> identity)
    returns: [batch, seq, layers_dims[-1]]
    """
    b, s, d0 = x.shape
    n = b * s
    d_last = params[-1]["w"].shape[0]
    num_layers = len(params)

    # Transposed activation layout: original rows live on the 128-wide lane
    # axis so all per-row scalars (LayerNorm stats, hyperbolic norms) are
    # lane-dense and the I/O blocks are full-lane unmasked stores.
    xT = x.reshape(n, d0).T                                   # [d0, n]

    # Large column tiles amortize the fixed per-grid-step cost; keep the grid
    # >= min_grid_steps (pipeline overlap + v7x megacore sharding) and cap the
    # tile so the footprint stays well inside v7x's 64 MiB VMEM.
    tile_cols = _round_up(max(pl.cdiv(n, min_grid_steps), 128), 128)
    tile_cols = min(tile_cols, _round_up(max_tile_cols, 128))
    grid = (pl.cdiv(n, tile_cols),)        # ragged last block, no jnp.pad copy

    flat_params = []
    param_specs = []
    for p in params:
        for name in ("w", "b", "gamma", "beta"):
            arr = p[name]
            flat_params.append(arr)
            # Full-array block with a constant index map -> resident in VMEM
            # across all grid steps (no per-tile re-DMA of the weights).
            param_specs.append(pl.BlockSpec(arr.shape, lambda i: (0, 0)))

    kernel = functools.partial(
        _cube_fused_kernel, num_layers=num_layers,
        curvature=curvature, ln_eps=ln_eps, ball_eps=ball_eps)

    outT = pl.pallas_call(
        kernel,
        out_shape=jax.ShapeDtypeStruct((d_last, n), x.dtype),
        grid_spec=pl.GridSpec(
            grid=grid,
            in_specs=[pl.BlockSpec((d0, tile_cols), lambda i: (0, i))]
                     + param_specs,
            out_specs=pl.BlockSpec((d_last, tile_cols), lambda i: (0, i)),
        ),
        compiler_params=pltpu.CompilerParams(
            dimension_semantics=("parallel",),
            vmem_limit_bytes=48 * 1024 * 1024),
    )(xT, *flat_params)

    return outT.T.reshape(b, s, d_last)


# ----------------------------------------------------------------------------
# Pure-JAX reference (mirrors the PyTorch module / geoopt semantics)
# ----------------------------------------------------------------------------
def _reference_forward(x, params, *, curvature=1.0, ln_eps=1e-5, ball_eps=4e-3):
    sqrt_c = curvature ** 0.5
    h = x
    for p in params:
        y = h @ p["w"].T + p["b"].reshape(-1)
        y = jnp.maximum(y, 0.0)
        mean = jnp.mean(y, axis=-1, keepdims=True)
        var = jnp.mean((y - mean) ** 2, axis=-1, keepdims=True)
        y = (y - mean) / jnp.sqrt(var + ln_eps)
        y = y * p["gamma"].reshape(-1) + p["beta"].reshape(-1)
        norm = jnp.maximum(jnp.linalg.norm(y, axis=-1, keepdims=True), 1e-15)
        out = jnp.tanh(sqrt_c * norm) * y / (sqrt_c * norm)
        onorm = jnp.maximum(jnp.linalg.norm(out, axis=-1, keepdims=True), 1e-15)
        maxnorm = (1.0 - ball_eps) / sqrt_c
        h = jnp.where(onorm > maxnorm, out / onorm * maxnorm, out)
    return h


# ----------------------------------------------------------------------------
# Deterministic parameter init (mirrors nn.Linear / nn.LayerNorm shapes)
# ----------------------------------------------------------------------------
def init_params(key, layers_dims):
    params = []
    for i in range(len(layers_dims) - 1):
        d_in, d_out = layers_dims[i], layers_dims[i + 1]
        key, kw, kb = jax.random.split(key, 3)
        bound = 1.0 / (d_in ** 0.5)
        # torch nn.Linear weight layout [out, in] -- used directly by the
        # transposed-layout kernel (yT = W @ hT).
        w = jax.random.uniform(kw, (d_out, d_in), jnp.float32, -bound, bound)
        bias = jax.random.uniform(kb, (d_out, 1), jnp.float32, -bound, bound)
        gamma = jnp.ones((d_out, 1), jnp.float32)
        beta = jnp.zeros((d_out, 1), jnp.float32)
        params.append({"w": w, "b": bias, "gamma": gamma, "beta": beta})
    return params


# ----------------------------------------------------------------------------
if __name__ == "__main__":
    key = jax.random.PRNGKey(0)

    batch, seq = 2, 8
    layers_dims = [32, 64, 32]

    key, kx = jax.random.split(key)
    x = jax.random.normal(kx, (batch, seq, layers_dims[0]), jnp.float32)
    params = init_params(key, layers_dims)

    out = hyperbolic_cube_forward(x, params, curvature=1.0)
    out = jax.block_until_ready(out)

    assert out.shape == (batch, seq, layers_dims[-1])
    assert bool(jnp.all(jnp.isfinite(out)))
    # Every output row must lie strictly inside the unit Poincare ball (c=1).
    norms = jnp.sqrt(jnp.sum(out * out, axis=-1))
    assert bool(jnp.all(norms <= 1.0))

    ref = _reference_forward(x, params, curvature=1.0)
    assert bool(jnp.allclose(out, ref, atol=1e-4, rtol=1e-4))

    print("KERNEL_OK")
</pallas_src>

<mosaic_0001>
module attributes {stable_mosaic.version = 11 : i64} {
  func.func @_cube_fused_kernel(%arg0: i32, %arg1: memref<32x128xf32, #tpu.memory_space<vmem>>, %arg2: memref<64x32xf32, #tpu.memory_space<vmem>>, %arg3: memref<64x1xf32, #tpu.memory_space<vmem>>, %arg4: memref<64x1xf32, #tpu.memory_space<vmem>>, %arg5: memref<64x1xf32, #tpu.memory_space<vmem>>, %arg6: memref<32x64xf32, #tpu.memory_space<vmem>>, %arg7: memref<32x1xf32, #tpu.memory_space<vmem>>, %arg8: memref<32x1xf32, #tpu.memory_space<vmem>>, %arg9: memref<32x1xf32, #tpu.memory_space<vmem>>, %arg10: memref<32x128xf32, #tpu.memory_space<vmem>>) attributes {dimension_semantics = [#tpu.dimension_semantics<parallel>], iteration_bounds = array<i64: 1>, scalar_prefetch = 0 : i64, scratch_operands = 0 : i64, tpu.core_type = #tpu.core_type<tc>, window_params = [{transform_indices = @transform_0, window_bounds = array<i64: 32, 128>}, {pipeline_mode = #tpu.pipeline_mode<synchronous>, transform_indices = @transform_1, window_bounds = array<i64: 64, 32>}, {pipeline_mode = #tpu.pipeline_mode<synchronous>, transform_indices = @transform_2, window_bounds = array<i64: 64, 1>}, {pipeline_mode = #tpu.pipeline_mode<synchronous>, transform_indices = @transform_3, window_bounds = array<i64: 64, 1>}, {pipeline_mode = #tpu.pipeline_mode<synchronous>, transform_indices = @transform_4, window_bounds = array<i64: 64, 1>}, {pipeline_mode = #tpu.pipeline_mode<synchronous>, transform_indices = @transform_5, window_bounds = array<i64: 32, 64>}, {pipeline_mode = #tpu.pipeline_mode<synchronous>, transform_indices = @transform_6, window_bounds = array<i64: 32, 1>}, {pipeline_mode = #tpu.pipeline_mode<synchronous>, transform_indices = @transform_7, window_bounds = array<i64: 32, 1>}, {pipeline_mode = #tpu.pipeline_mode<synchronous>, transform_indices = @transform_8, window_bounds = array<i64: 32, 1>}, {transform_indices = @transform_9, window_bounds = array<i64: 32, 128>}]} {
    %c0 = arith.constant 0 : index
    %c0_0 = arith.constant 0 : index
    %0 = vector.load %arg1[%c0, %c0_0] : memref<32x128xf32, #tpu.memory_space<vmem>>, vector<32x128xf32>
    %c0_1 = arith.constant 0 : index
    %c0_2 = arith.constant 0 : index
    %1 = vector.load %arg2[%c0_1, %c0_2] : memref<64x32xf32, #tpu.memory_space<vmem>>, vector<64x32xf32>
    %cst = arith.constant dense<0.000000e+00> : vector<64x128xf32>
    %2 = tpu.matmul %1, %0, %cst {dimension_numbers = #tpu.dot_dimension_numbers<[1], [0], [0], [1], [0, 0, 1, 1], [], []>} : vector<64x32xf32>, vector<32x128xf32>, vector<64x128xf32> -> vector<64x128xf32>
    %c0_3 = arith.constant 0 : index
    %c0_4 = arith.constant 0 : index
    %3 = vector.load %arg3[%c0_3, %c0_4] : memref<64x1xf32, #tpu.memory_space<vmem>>, vector<64x1xf32>
    %4 = vector.broadcast %3 : vector<64x1xf32> to vector<64x128xf32>
    %5 = arith.addf %2, %4 : vector<64x128xf32>
    %cst_5 = arith.constant 0.000000e+00 : f32
    %6 = vector.broadcast %cst_5 : f32 to vector<64x128xf32>
    %7 = arith.maximumf %5, %6 : vector<64x128xf32>
    %cst_6 = arith.constant dense<0.000000e+00> : vector<128xf32>
    %8 = vector.multi_reduction <add>, %7, %cst_6 [0] : vector<64x128xf32> to vector<128xf32>
    %9 = vector.shape_cast %8 : vector<128xf32> to vector<1x128xf32>
    %10 = arith.mulf %7, %7 : vector<64x128xf32>
    %cst_7 = arith.constant dense<0.000000e+00> : vector<128xf32>
    %11 = vector.multi_reduction <add>, %10, %cst_7 [0] : vector<64x128xf32> to vector<128xf32>
    %12 = vector.shape_cast %11 : vector<128xf32> to vector<1x128xf32>
    %cst_8 = arith.constant 1.562500e-02 : f32
    %13 = vector.broadcast %cst_8 : f32 to vector<1x128xf32>
    %14 = arith.mulf %9, %13 : vector<1x128xf32>
    %cst_9 = arith.constant 1.562500e-02 : f32
    %15 = vector.broadcast %cst_9 : f32 to vector<1x128xf32>
    %16 = arith.mulf %12, %15 : vector<1x128xf32>
    %17 = arith.mulf %14, %14 : vector<1x128xf32>
    %18 = arith.subf %16, %17 : vector<1x128xf32>
    %cst_10 = arith.constant 0.000000e+00 : f32
    %19 = vector.broadcast %cst_10 : f32 to vector<1x128xf32>
    %20 = arith.maximumf %18, %19 : vector<1x128xf32>
    %21 = vector.broadcast %14 : vector<1x128xf32> to vector<64x128xf32>
    %22 = arith.subf %7, %21 : vector<64x128xf32>
    %cst_11 = arith.constant 9.99999974E-6 : f32
    %23 = vector.broadcast %cst_11 : f32 to vector<1x128xf32>
    %24 = arith.addf %20, %23 : vector<1x128xf32>
    %25 = math.rsqrt %24 : vector<1x128xf32>
    %26 = vector.broadcast %25 : vector<1x128xf32> to vector<64x128xf32>
    %27 = arith.mulf %22, %26 : vector<64x128xf32>
    %c0_12 = arith.constant 0 : index
    %c0_13 = arith.constant 0 : index
    %28 = vector.load %arg4[%c0_12, %c0_13] : memref<64x1xf32, #tpu.memory_space<vmem>>, vector<64x1xf32>
    %29 = vector.broadcast %28 : vector<64x1xf32> to vector<64x128xf32>
    %30 = arith.mulf %27, %29 : vector<64x128xf32>
    %c0_14 = arith.constant 0 : index
    %c0_15 = arith.constant 0 : index
    %31 = vector.load %arg5[%c0_14, %c0_15] : memref<64x1xf32, #tpu.memory_space<vmem>>, vector<64x1xf32>
    %32 = vector.broadcast %31 : vector<64x1xf32> to vector<64x128xf32>
    %33 = arith.addf %30, %32 : vector<64x128xf32>
    %34 = arith.mulf %33, %33 : vector<64x128xf32>
    %cst_16 = arith.constant dense<0.000000e+00> : vector<128xf32>
    %35 = vector.multi_reduction <add>, %34, %cst_16 [0] : vector<64x128xf32> to vector<128xf32>
    %36 = vector.shape_cast %35 : vector<128xf32> to vector<1x128xf32>
    %cst_17 = arith.constant 1.000000e-30 : f32
    %37 = vector.broadcast %cst_17 : f32 to vector<1x128xf32>
    %38 = arith.maximumf %36, %37 : vector<1x128xf32>
    %39 = math.rsqrt %38 : vector<1x128xf32>
    %40 = arith.mulf %38, %39 : vector<1x128xf32>
    %41 = math.tanh %40 : vector<1x128xf32>
    %cst_18 = arith.constant 0.995999991 : f32
    %42 = vector.broadcast %cst_18 : f32 to vector<1x128xf32>
    %43 = arith.minimumf %41, %42 : vector<1x128xf32>
    %44 = arith.mulf %43, %39 : vector<1x128xf32>
    %45 = vector.broadcast %44 : vector<1x128xf32> to vector<64x128xf32>
    %46 = arith.mulf %33, %45 : vector<64x128xf32>
    %c0_19 = arith.constant 0 : index
    %c0_20 = arith.constant 0 : index
    %47 = vector.load %arg6[%c0_19, %c0_20] : memref<32x64xf32, #tpu.memory_space<vmem>>, vector<32x64xf32>
    %cst_21 = arith.constant dense<0.000000e+00> : vector<32x128xf32>
    %48 = tpu.matmul %47, %46, %cst_21 {dimension_numbers = #tpu.dot_dimension_numbers<[1], [0], [0], [1], [0, 0, 1, 1], [], []>} : vector<32x64xf32>, vector<64x128xf32>, vector<32x128xf32> -> vector<32x128xf32>
    %c0_22 = arith.constant 0 : index
    %c0_23 = arith.constant 0 : index
    %49 = vector.load %arg7[%c0_22, %c0_23] : memref<32x1xf32, #tpu.memory_space<vmem>>, vector<32x1xf32>
    %50 = vector.broadcast %49 : vector<32x1xf32> to vector<32x128xf32>
    %51 = arith.addf %48, %50 : vector<32x128xf32>
    %cst_24 = arith.constant 0.000000e+00 : f32
    %52 = vector.broadcast %cst_24 : f32 to vector<32x128xf32>
    %53 = arith.maximumf %51, %52 : vector<32x128xf32>
    %cst_25 = arith.constant dense<0.000000e+00> : vector<128xf32>
    %54 = vector.multi_reduction <add>, %53, %cst_25 [0] : vector<32x128xf32> to vector<128xf32>
    %55 = vector.shape_cast %54 : vector<128xf32> to vector<1x128xf32>
    %56 = arith.mulf %53, %53 : vector<32x128xf32>
    %cst_26 = arith.constant dense<0.000000e+00> : vector<128xf32>
    %57 = vector.multi_reduction <add>, %56, %cst_26 [0] : vector<32x128xf32> to vector<128xf32>
    %58 = vector.shape_cast %57 : vector<128xf32> to vector<1x128xf32>
    %cst_27 = arith.constant 3.125000e-02 : f32
    %59 = vector.broadcast %cst_27 : f32 to vector<1x128xf32>
    %60 = arith.mulf %55, %59 : vector<1x128xf32>
    %cst_28 = arith.constant 3.125000e-02 : f32
    %61 = vector.broadcast %cst_28 : f32 to vector<1x128xf32>
    %62 = arith.mulf %58, %61 : vector<1x128xf32>
    %63 = arith.mulf %60, %60 : vector<1x128xf32>
    %64 = arith.subf %62, %63 : vector<1x128xf32>
    %cst_29 = arith.constant 0.000000e+00 : f32
    %65 = vector.broadcast %cst_29 : f32 to vector<1x128xf32>
    %66 = arith.maximumf %64, %65 : vector<1x128xf32>
    %67 = vector.broadcast %60 : vector<1x128xf32> to vector<32x128xf32>
    %68 = arith.subf %53, %67 : vector<32x128xf32>
    %cst_30 = arith.constant 9.99999974E-6 : f32
    %69 = vector.broadcast %cst_30 : f32 to vector<1x128xf32>
    %70 = arith.addf %66, %69 : vector<1x128xf32>
    %71 = math.rsqrt %70 : vector<1x128xf32>
    %72 = vector.broadcast %71 : vector<1x128xf32> to vector<32x128xf32>
    %73 = arith.mulf %68, %72 : vector<32x128xf32>
    %c0_31 = arith.constant 0 : index
    %c0_32 = arith.constant 0 : index
    %74 = vector.load %arg8[%c0_31, %c0_32] : memref<32x1xf32, #tpu.memory_space<vmem>>, vector<32x1xf32>
    %75 = vector.broadcast %74 : vector<32x1xf32> to vector<32x128xf32>
    %76 = arith.mulf %73, %75 : vector<32x128xf32>
    %c0_33 = arith.constant 0 : index
    %c0_34 = arith.constant 0 : index
    %77 = vector.load %arg9[%c0_33, %c0_34] : memref<32x1xf32, #tpu.memory_space<vmem>>, vector<32x1xf32>
    %78 = vector.broadcast %77 : vector<32x1xf32> to vector<32x128xf32>
    %79 = arith.addf %76, %78 : vector<32x128xf32>
    %80 = arith.mulf %79, %79 : vector<32x128xf32>
    %cst_35 = arith.constant dense<0.000000e+00> : vector<128xf32>
    %81 = vector.multi_reduction <add>, %80, %cst_35 [0] : vector<32x128xf32> to vector<128xf32>
    %82 = vector.shape_cast %81 : vector<128xf32> to vector<1x128xf32>
    %cst_36 = arith.constant 1.000000e-30 : f32
    %83 = vector.broadcast %cst_36 : f32 to vector<1x128xf32>
    %84 = arith.maximumf %82, %83 : vector<1x128xf32>
    %85 = math.rsqrt %84 : vector<1x128xf32>
    %86 = arith.mulf %84, %85 : vector<1x128xf32>
    %87 = math.tanh %86 : vector<1x128xf32>
    %cst_37 = arith.constant 0.995999991 : f32
    %88 = vector.broadcast %cst_37 : f32 to vector<1x128xf32>
    %89 = arith.minimumf %87, %88 : vector<1x128xf32>
    %90 = arith.mulf %89, %85 : vector<1x128xf32>
    %91 = vector.broadcast %90 : vector<1x128xf32> to vector<32x128xf32>
    %92 = arith.mulf %79, %91 : vector<32x128xf32>
    %c0_38 = arith.constant 0 : index
    %c0_39 = arith.constant 0 : index
    %93 = vector.load %arg10[%c0_38, %c0_39] : memref<32x128xf32, #tpu.memory_space<vmem>>, vector<32x128xf32>
    tpu.vector_store %arg10[%c0_38, %c0_39], %92 {strides = array<i32>} : memref<32x128xf32, #tpu.memory_space<vmem>>, vector<32x128xf32>,
    return
  }
  func.func @transform_0(%arg0: i32) -> (i32, i32) {
    %c0_i32 = arith.constant 0 : i32
    %c0_i32_0 = arith.constant 0 : i32
    return %c0_i32, %arg0 : i32, i32
  }
  func.func @transform_1(%arg0: i32) -> (i32, i32) {
    %c0_i32 = arith.constant 0 : i32
    %c0_i32_0 = arith.constant 0 : i32
    %c0_i32_1 = arith.constant 0 : i32
    return %c0_i32, %c0_i32_0 : i32, i32
  }
  func.func @transform_2(%arg0: i32) -> (i32, i32) {
    %c0_i32 = arith.constant 0 : i32
    %c0_i32_0 = arith.constant 0 : i32
    %c0_i32_1 = arith.constant 0 : i32
    return %c0_i32, %c0_i32_0 : i32, i32
  }
  func.func @transform_3(%arg0: i32) -> (i32, i32) {
    %c0_i32 = arith.constant 0 : i32
    %c0_i32_0 = arith.constant 0 : i32
    %c0_i32_1 = arith.constant 0 : i32
    return %c0_i32, %c0_i32_0 : i32, i32
  }
  func.func @transform_4(%arg0: i32) -> (i32, i32) {
    %c0_i32 = arith.constant 0 : i32
    %c0_i32_0 = arith.constant 0 : i32
    %c0_i32_1 = arith.constant 0 : i32
    return %c0_i32, %c0_i32_0 : i32, i32
  }
  func.func @transform_5(%arg0: i32) -> (i32, i32) {
    %c0_i32 = arith.constant 0 : i32
    %c0_i32_0 = arith.constant 0 : i32
    %c0_i32_1 = arith.constant 0 : i32
    return %c0_i32, %c0_i32_0 : i32, i32
  }
  func.func @transform_6(%arg0: i32) -> (i32, i32) {
    %c0_i32 = arith.constant 0 : i32
    %c0_i32_0 = arith.constant 0 : i32
    %c0_i32_1 = arith.constant 0 : i32
    return %c0_i32, %c0_i32_0 : i32, i32
  }
  func.func @transform_7(%arg0: i32) -> (i32, i32) {
    %c0_i32 = arith.constant 0 : i32
    %c0_i32_0 = arith.constant 0 : i32
    %c0_i32_1 = arith.constant 0 : i32
    return %c0_i32, %c0_i32_0 : i32, i32
  }
  func.func @transform_8(%arg0: i32) -> (i32, i32) {
    %c0_i32 = arith.constant 0 : i32
    %c0_i32_0 = arith.constant 0 : i32
    %c0_i32_1 = arith.constant 0 : i32
    return %c0_i32, %c0_i32_0 : i32, i32
  }
  func.func @transform_9(%arg0: i32) -> (i32, i32) {
    %c0_i32 = arith.constant 0 : i32
    %c0_i32_0 = arith.constant 0 : i32
    return %c0_i32, %arg0 : i32, i32
  }
}

</mosaic_0001>

<bundles_post_ra>
// kernel: tpu_custom_call.1
= control target key start
LH: loop header
LB: loop body
LE: loop exit
PB: predicated region body
PF: predicated region fallthrough
CT: control target
= control target key end

     0   :  { %vm92_vm0 = vcmask 261120   ;;  %v781_v2 = vmov 0   ;;  %vm462_vm1 = vcmask 523264   ;;  %s1059_s0 = inlined_call_operand.vmem [shape: f32[32,16], index: 0, kind: input, shape index: {}]   ;;  %s1060_s1 = inlined_call_operand.vmem [shape: f32[64,32], index: 1, kind: input, shape index: {}]   ;;  %s1061_s2 = inlined_call_operand.vmem [shape: f32[64,1], index: 2, kind: input, shape index: {}]   ;;  %s1062_s3 = inlined_call_operand.vmem [shape: f32[64,1], index: 3, kind: input, shape index: {}]   ;;  %s1063_s4 = inlined_call_operand.vmem [shape: f32[64,1], index: 4, kind: input, shape index: {}]   ;;  %s1064_s6 = inlined_call_operand.vmem [shape: f32[32,1], index: 6, kind: input, shape index: {}]   ;;  %s1065_s7 = inlined_call_operand.vmem [shape: f32[32,1], index: 7, kind: input, shape index: {}]   ;;  %s1066_s8 = inlined_call_operand.vmem [shape: f32[32,1], index: 8, kind: input, shape index: {}]   ;;  %s1067_s5 = inlined_call_operand.vmem [shape: f32[32,64], index: 5, kind: input, shape index: {}]   ;;  %s1068_s9 = inlined_call_operand.vmem [shape: f32[32,16], index: 9, kind: output, shape index: {}]  }
   0x1   :  { %v35_v0 = vld [vmem:[%s1059_s0 + $0x18] sm:$0xff]  ;;  %v34_v1 = vld [vmem:[%s1059_s0 + $0x10] sm:$0xff]  ;;  %767 = vset.pattern.permute.xlu0 %v781_v2  ;;  %768 = vset.pattern.permute.xlu1 %v781_v2  ;;  %v36_v3 = vld [vmem:[%s1060_s1] sm:$0xff] }
   0x2   :  { %724 = vmatprep.subr.mxu0 %v35_v0  ;;  %v33_v4 = vld [vmem:[%s1059_s0 + $0x8] sm:$0xff]  ;;  %732 = vmatprep.mubr.msk.f32.mxu0 %vm92_vm0, %v36_v3  ;;  %v44_v5 = vld [vmem:[%s1061_s2] sm:$0xff]  ;;  %v46_v6 = vld [vmem:[%s1061_s2 + $0x10] sm:$0xff] }
   0x3   :  { %725 = vmatpush3.msra.mxu0 %v35_v0  ;;  %54 = vperm.xlu0 %767, %v44_v5   ;;  %v32_v7 = vld [vmem:[%s1059_s0] sm:$0xff]  ;;  %v45_v8 = vld [vmem:[%s1061_s2 + $0x8] sm:$0xff]  ;;  %v47_v9 = vld [vmem:[%s1061_s2 + $0x18] sm:$0xff] }
   0x4   :  { %726 = vmatprep.subr.mxu0 %v34_v1  ;;  %64 = vperm.xlu1 %768, %v46_v6   ;;  %v37_v10 = vld [vmem:[%s1060_s1 + $0x8] sm:$0xff]  ;;  %v38_v11 = vld [vmem:[%s1060_s1 + $0x10] sm:$0xff]  ;;  %v48_v12 = vld [vmem:[%s1061_s2 + $0x20] sm:$0xff] }
   0x5   :  { %727 = vmatpush3.msra.mxu0 %v34_v1  ;;  %v49_v13 = vld [vmem:[%s1061_s2 + $0x28] sm:$0xff]  ;;  %v39_v14 = vld [vmem:[%s1060_s1 + $0x18] sm:$0xff]  ;;  %v40_v15 = vld [vmem:[%s1060_s1 + $0x20] sm:$0xff] }
   0x6   :  { %728 = vmatprep.subr.mxu0 %v33_v4  ;;  %v50_v16 = vld [vmem:[%s1061_s2 + $0x30] sm:$0xff]  ;;  %v51_v17 = vld [vmem:[%s1061_s2 + $0x38] sm:$0xff]  ;;  %v41_v18 = vld [vmem:[%s1060_s1 + $0x28] sm:$0xff] }
   0x7   :  { %729 = vmatpush3.msra.mxu0 %v33_v4  ;;  %59 = vperm.xlu0 %767, %v45_v8   ;;  %v42_v19 = vld [vmem:[%s1060_s1 + $0x30] sm:$0xff]  ;;  %v287_v20 = vld [vmem:[%s1062_s3] sm:$0xff]  ;;  %v288_v21 = vld [vmem:[%s1062_s3 + $0x8] sm:$0xff] }
   0x8   :  { %730 = vmatprep.subr.mxu0 %v32_v7  ;;  %69 = vperm.xlu1 %768, %v47_v9   ;;  %v43_v22 = vld [vmem:[%s1060_s1 + $0x38] sm:$0xff]  ;;  %v289_v23 = vld [vmem:[%s1062_s3 + $0x10] sm:$0xff]  ;;  %v343_v24 = vld [vmem:[%s1063_s4] sm:$0xff] }
   0x9   :  { %731 = vmatpush3.msra.mxu0 %v32_v7  ;;  %v344_v25 = vld [vmem:[%s1063_s4 + $0x8] sm:$0xff]  ;;  %v290_v26 = vld [vmem:[%s1062_s3 + $0x18] sm:$0xff]  ;;  %v345_v27 = vld [vmem:[%s1063_s4 + $0x10] sm:$0xff] }
   0xa   :  { %733 = vmatmul.mubr.msk.f32.vlgmr.msra.gmra.mxu0 %vm92_vm0, %v37_v10  ;;  %v291_v28 = vld [vmem:[%s1062_s3 + $0x20] sm:$0xff]  ;;  %v346_v29 = vld [vmem:[%s1063_s4 + $0x18] sm:$0xff]  ;;  %v292_v30 = vld [vmem:[%s1062_s3 + $0x28] sm:$0xff] }
   0xb   :  { %735 = vmatprep.mubr.msk.f32.mxu0 %vm92_vm0, %v38_v11  ;;  %74 = vperm.xlu0 %767, %v48_v12   ;;  %v347_v31 = vld [vmem:[%s1063_s4 + $0x20] sm:$0xff]  ;;  %v293_v32 = vld [vmem:[%s1062_s3 + $0x30] sm:$0xff]  ;;  %v348_v33 = vld [vmem:[%s1063_s4 + $0x28] sm:$0xff] }
   0xc   :  { %79 = vperm.xlu1 %768, %v49_v13   ;;  %v294_v34 = vld [vmem:[%s1062_s3 + $0x38] sm:$0xff]  ;;  %v349_v35 = vld [vmem:[%s1063_s4 + $0x30] sm:$0xff]  ;;  %v438_v37 = vld [vmem:[%s1064_s6] sm:$0xff] }
   0xd   :  { %v350_v36 = vld [vmem:[%s1063_s4 + $0x38] sm:$0xff]  ;;  %v439_v38 = vld [vmem:[%s1064_s6 + $0x8] sm:$0xff]  ;;  %v440_v39 = vld [vmem:[%s1064_s6 + $0x10] sm:$0xff] }
   0xe   :  { %736 = vmatmul.mubr.msk.f32.gmra.mxu0 %vm92_vm0, %v39_v14  ;;  %v441_v40 = vld [vmem:[%s1064_s6 + $0x18] sm:$0xff]  ;;  %v601_v41 = vld [vmem:[%s1065_s7] sm:$0xff]  ;;  %v602_v42 = vld [vmem:[%s1065_s7 + $0x8] sm:$0xff] }
   0xf   :  { %738 = vmatprep.mubr.msk.f32.mxu0 %vm92_vm0, %v40_v15  ;;  %84 = vperm.xlu0 %767, %v50_v16   ;;  %v603_v43 = vld [vmem:[%s1065_s7 + $0x10] sm:$0xff]  ;;  %v629_v44 = vld [vmem:[%s1066_s8] sm:$0xff]  ;;  %v630_v45 = vld [vmem:[%s1066_s8 + $0x8] sm:$0xff] }
  0x10   :  { %89 = vperm.xlu1 %768, %v51_v17   ;;  %v604_v46 = vld [vmem:[%s1065_s7 + $0x18] sm:$0xff]  ;;  %v631_v47 = vld [vmem:[%s1066_s8 + $0x10] sm:$0xff] }
  0x11   :  { %v632_v48 = vld [vmem:[%s1066_s8 + $0x18] sm:$0xff] }
  0x12   :  { %739 = vmatmul.mubr.msk.f32.gmra.mxu0 %vm92_vm0, %v41_v18 }
  0x13   :  { %741 = vmatprep.mubr.msk.f32.mxu0 %vm92_vm0, %v42_v19  ;;  %297 = vperm.xlu0 %767, %v287_v20  }
  0x14   :  { %302 = vperm.xlu1 %768, %v288_v21  }
  0x16   :  { %742 = vmatmul.mubr.msk.f32.gmra.mxu0 %vm92_vm0, %v43_v22 }
  0x17   :  { %307 = vperm.xlu0 %767, %v289_v23  }
  0x18   :  { %353 = vperm.xlu1 %768, %v343_v24  }
  0x1b   :  { %358 = vperm.xlu0 %767, %v344_v25  }
  0x1c   :  { %312 = vperm.xlu1 %768, %v290_v26  }
  0x1f   :  { %363 = vperm.xlu0 %767, %v345_v27  }
  0x20   :  { %317 = vperm.xlu1 %768, %v291_v28  }
  0x23   :  { %368 = vperm.xlu0 %767, %v346_v29  }
  0x24   :  { %322 = vperm.xlu1 %768, %v292_v30  }
  0x27   :  { %373 = vperm.xlu0 %767, %v347_v31  }
  0x28   :  { %327 = vperm.xlu1 %768, %v293_v32  }
  0x2b   :  { %378 = vperm.xlu0 %767, %v348_v33  }
  0x2c   :  { %332 = vperm.xlu1 %768, %v294_v34  }
  0x2f   :  { %383 = vperm.xlu0 %767, %v349_v35   ;;  %v434_v35 = vld [vmem:[%s1067_s5] sm:$0xff] }
  0x30   :  { %388 = vperm.xlu1 %768, %v350_v36   ;;  %760 = vmatprep.mubr.msk.f32.mxu1 %vm462_vm1, %v434_v35 }
  0x33   :  { %444 = vperm.xlu0 %767, %v438_v37  }
  0x34   :  { %449 = vperm.xlu1 %768, %v439_v38  }
  0x37   :  { %454 = vperm.xlu0 %767, %v440_v39  }
  0x38   :  { %459 = vperm.xlu1 %768, %v441_v40  }
  0x3b   :  { %607 = vperm.xlu0 %767, %v601_v41  }
  0x3c   :  { %612 = vperm.xlu1 %768, %v602_v42  }
  0x3f   :  { %617 = vperm.xlu0 %767, %v603_v43  }
  0x40   :  { %635 = vperm.xlu1 %768, %v629_v44  }
  0x43   :  { %640 = vperm.xlu0 %767, %v630_v45  }
  0x44   :  { %622 = vperm.xlu1 %768, %v604_v46  }
  0x47   :  { %645 = vperm.xlu0 %767, %v631_v47  }
  0x48   :  { %650 = vperm.xlu1 %768, %v632_v48  }
  0x7e   :  { %v55_v49 = vpop.permute.xlu0 %54 }
  0x7f   :  { %v65_v50 = vpop.permute.xlu1 %64 }
  0x82   :  { %v60_v51 = vpop.permute.xlu0 %59 }
  0x83   :  { %v70_v53 = vpop.permute.xlu1 %69 }
  0x86   :  { %v75_v1 = vpop.permute.xlu0 %74 }
  0x87   :  { %v80_v62 = vpop.permute.xlu1 %79 }
  0x8a   :  { %v85_v20 = vpop.permute.xlu0 %84 }
  0x8b   :  { %v90_v15 = vpop.permute.xlu1 %89 }
  0x8e   :  { %v298_v45 = vpop.permute.xlu0 %297 }
  0x8f   :  { %v303_v48 = vpop.permute.xlu1 %302 }
  0xca   :  { %v734_v52 = vpop.f32.mrf.mxu0 }
  0xcb   :  { %v189_v54 = vadd.f32 %v734_v52, %v60_v51 }
  0xcc   :  { %v183_v55 = vpop.f32.mrf.mxu0 }
  0xcd   :  { %v184_v56 = vadd.f32 %v183_v55, %v55_v49  ;;  %v984_v57 = vmax.f32 %v189_v54, 0.0 }
  0xce   :  { %v737_v58 = vpop.f32.mrf.mxu0 }
  0xcf   :  { %v986_v59 = vmax.f32 %v184_v56, 0.0  ;;  %v199_v60 = vadd.f32 %v737_v58, %v70_v53  ;;  %v244_v2 = vmul.f32 %v984_v57, %v984_v57  ;;  %v308_v53 = vpop.permute.xlu0 %307  ;;  %v354_v56 = vpop.permute.xlu1 %353 }
  0xd0   :  { %v193_v61 = vpop.f32.mrf.mxu0 }
  0xd1   :  { %v243_v63 = vmul.f32 %v986_v59, %v986_v59  ;;  %v194_v0 = vadd.f32 %v193_v61, %v65_v50  ;;  %v230_v4 = vadd.f32 %v984_v57, %v986_v59  ;;  %v994_v5 = vmax.f32 %v199_v60, 0.0 }
  0xd2   :  { %v740_v3 = vpop.f32.mrf.mxu0 }
  0xd3   :  { %v996_v6 = vmax.f32 %v194_v0, 0.0  ;;  %v209_v7 = vadd.f32 %v740_v3, %v80_v62  ;;  %v251_v9 = vadd.f32 %v244_v2, %v243_v63  ;;  %v246_v16 = vmul.f32 %v994_v5, %v994_v5  ;;  %v359_v62 = vpop.permute.xlu0 %358  ;;  %v313_v0 = vpop.permute.xlu1 %312 }
  0xd4   :  { %v203_v8 = vpop.f32.mrf.mxu0 }
  0xd5   :  { %v231_v10 = vadd.f32 %v230_v4, %v996_v6  ;;  %v245_v11 = vmul.f32 %v996_v6, %v996_v6  ;;  %v204_v12 = vadd.f32 %v203_v8, %v75_v1  ;;  %v1001_v13 = vmax.f32 %v209_v7, 0.0 }
  0xd6   :  { %v743_v14 = vpop.f32.mrf.mxu0 }
  0xd7   :  { %v252_v17 = vadd.f32 %v251_v9, %v245_v11  ;;  %v1005_v18 = vmax.f32 %v204_v12, 0.0  ;;  %v232_v19 = vadd.f32 %v231_v10, %v994_v5  ;;  %v219_v21 = vadd.f32 %v743_v14, %v90_v15  ;;  %v364_v2 = vpop.permute.xlu0 %363  ;;  %v318_v3 = vpop.permute.xlu1 %317 }
  0xd8   :  { %v213_v22 = vpop.f32.mrf.mxu0  ;;  %v248_v27 = vmul.f32 %v1001_v13, %v1001_v13 }
  0xd9   :  { %v233_v23 = vadd.f32 %v232_v19, %v1005_v18  ;;  %v247_v24 = vmul.f32 %v1005_v18, %v1005_v18  ;;  %v253_v25 = vadd.f32 %v252_v17, %v246_v16  ;;  %v214_v26 = vadd.f32 %v213_v22, %v85_v20 }
  0xda   :  { %v1013_v29 = vmax.f32 %v219_v21, 0.0 }
  0xdb   :  { %v254_v28 = vadd.f32 %v253_v25, %v247_v24  ;;  %v228_v30 = vmax.f32 %v214_v26, 0.0  ;;  %v234_v31 = vadd.f32 %v233_v23, %v1001_v13  ;;  %v369_v4 = vpop.permute.xlu0 %368  ;;  %v323_v7 = vpop.permute.xlu1 %322 }
  0xdc   :  { %v250_v36 = vmul.f32 %v1013_v29, %v1013_v29 }
  0xdd   :  { %v235_v32 = vadd.f32 %v234_v31, %v228_v30  ;;  %v249_v33 = vmul.f32 %v228_v30, %v228_v30  ;;  %v255_v34 = vadd.f32 %v254_v28, %v248_v27 }
  0xdf   :  { %v236_v37 = vadd.f32 %v235_v32, %v1013_v29  ;;  %v256_v38 = vadd.f32 %v255_v34, %v249_v33  ;;  %v374_v12 = vpop.permute.xlu0 %373  ;;  %v328_v21 = vpop.permute.xlu1 %327 }
  0xe1   :  { %v237_v39 = vrot.slane %v236_v37, 4  ;;  %v257_v40 = vadd.f32 %v256_v38, %v250_v36 }
  0xe3   :  { %v238_v41 = vadd.f32 %v237_v39, %v236_v37  ;;  %v258_v42 = vrot.slane %v257_v40, 4  ;;  %v379_v32 = vpop.permute.xlu0 %378  ;;  %v333_v37 = vpop.permute.xlu1 %332 }
  0xe5   :  { %v239_v43 = vrot.slane %v238_v41, 2  ;;  %v259_v44 = vadd.f32 %v258_v42, %v257_v40 }
  0xe7   :  { %v240_v46 = vadd.f32 %v239_v43, %v238_v41  ;;  %v260_v47 = vrot.slane %v259_v44, 2 }
  0xe9   :  { %v241_v49 = vrot.slane %v240_v46, 1  ;;  %v261_v50 = vadd.f32 %v260_v47, %v259_v44 }
  0xeb   :  { %v242_v51 = vadd.f32 %v241_v49, %v240_v46  ;;  %v262_v52 = vrot.slane %v261_v50, 1  ;;  %v389_v49 = vpop.permute.xlu1 %388 }
  0xed   :  { %v263_v54 = vadd.f32 %v262_v52, %v261_v50  ;;  %v264_v55 = vmul.f32 0.015625, %v242_v51 }
  0xef   :  { %v265_v58 = vmul.f32 0.015625, %v263_v54  ;;  %v266_v60 = vmul.f32 %v264_v55, %v264_v55  ;;  %v269_v8 = vsub.f32 %v986_v59, %v264_v55  ;;  %v270_v9 = vsub.f32 %v984_v57, %v264_v55 }
  0xf0   :  { %v271_v10 = vsub.f32 %v996_v6, %v264_v55  ;;  %v272_v14 = vsub.f32 %v994_v5, %v264_v55  ;;  %v273_v15 = vsub.f32 %v1005_v18, %v264_v55  ;;  %v274_v16 = vsub.f32 %v1001_v13, %v264_v55 }
  0xf1   :  { %v267_v61 = vsub.f32 %v265_v58, %v266_v60  ;;  %v275_v22 = vsub.f32 %v228_v30, %v264_v55  ;;  %v276_v27 = vsub.f32 %v1013_v29, %v264_v55 }
  0xf3   :  { %v268_v63 = vmax.f32 %v267_v61, 0.0 }
  0xf5   :  { %v277_v1 = vadd.f32 1e-05, %v268_v63 }
  0xf7   :  { %769 = vrsqrt.f32 %v277_v1 }
 0x104   :  { %v770_v11 = vpop.eup %769 }
 0x105   :  { %v279_v17 = vmul.f32 %v770_v11, %v269_v8  ;;  %v280_v19 = vmul.f32 %v770_v11, %v270_v9  ;;  %v281_v20 = vmul.f32 %v770_v11, %v271_v10  ;;  %v282_v23 = vmul.f32 %v770_v11, %v272_v14 }
 0x106   :  { %v283_v24 = vmul.f32 %v770_v11, %v273_v15  ;;  %v284_v59 = vmul.f32 %v770_v11, %v274_v16  ;;  %v285_v6 = vmul.f32 %v770_v11, %v275_v22  ;;  %v286_v33 = vmul.f32 %v770_v11, %v276_v27  ;;  %v437_v22 = vld [vmem:[%s1067_s5 + $0x18] sm:$0xff] }
 0x107   :  { %v335_v25 = vmul.f32 %v298_v45, %v279_v17  ;;  %v336_v57 = vmul.f32 %v303_v48, %v280_v19  ;;  %v337_v26 = vmul.f32 %v308_v53, %v281_v20  ;;  %v338_v28 = vmul.f32 %v313_v0, %v282_v23  ;;  %v384_v45 = vpop.permute.xlu0 %383  ;;  %v435_v20 = vld [vmem:[%s1067_s5 + $0x8] sm:$0xff]  ;;  %v450_v23 = vpop.permute.xlu1 %449 }
 0x108   :  { %v339_v5 = vmul.f32 %v318_v3, %v283_v24  ;;  %v340_v34 = vmul.f32 %v323_v7, %v284_v59  ;;  %v341_v38 = vmul.f32 %v328_v21, %v285_v6  ;;  %v342_v29 = vmul.f32 %v333_v37, %v286_v33  ;;  %v436_v21 = vld [vmem:[%s1067_s5 + $0x10] sm:$0xff] }
 0x109   :  { %v1030_v31 = vadd.f32 %v354_v56, %v335_v25  ;;  %v392_v18 = vadd.f32 %v359_v62, %v336_v57  ;;  %v393_v13 = vadd.f32 %v364_v2, %v337_v26  ;;  %v394_v35 = vadd.f32 %v369_v4, %v338_v28 }
 0x10a   :  { %v395_v39 = vadd.f32 %v374_v12, %v339_v5  ;;  %v396_v42 = vadd.f32 %v379_v32, %v340_v34  ;;  %v397_v46 = vadd.f32 %v384_v45, %v341_v38  ;;  %v398_v50 = vadd.f32 %v389_v49, %v342_v29 }
 0x10b   :  { %v399_v30 = vmul.f32 %v1030_v31, %v1030_v31  ;;  %v400_v36 = vmul.f32 %v392_v18, %v392_v18  ;;  %v401_v40 = vmul.f32 %v393_v13, %v393_v13  ;;  %v402_v43 = vmul.f32 %v394_v35, %v394_v35  ;;  %v445_v24 = vpop.permute.xlu0 %444  ;;  %v460_v6 = vpop.permute.xlu1 %459 }
 0x10c   :  { %v403_v47 = vmul.f32 %v395_v39, %v395_v39  ;;  %v404_v51 = vmul.f32 %v396_v42, %v396_v42  ;;  %v405_v53 = vmul.f32 %v397_v46, %v397_v46  ;;  %v406_v55 = vmul.f32 %v398_v50, %v398_v50 }
 0x10d   :  { %v407_v41 = vadd.f32 %v400_v36, %v399_v30 }
 0x10f   :  { %v408_v44 = vadd.f32 %v407_v41, %v401_v40 }
 0x111   :  { %v409_v48 = vadd.f32 %v408_v44, %v402_v43 }
 0x113   :  { %v410_v52 = vadd.f32 %v409_v48, %v403_v47 }
 0x115   :  { %v411_v54 = vadd.f32 %v410_v52, %v404_v51 }
 0x117   :  { %v412_v56 = vadd.f32 %v411_v54, %v405_v53 }
 0x119   :  { %v413_v58 = vadd.f32 %v412_v56, %v406_v55 }
 0x11b   :  { %v414_v60 = vrot.slane %v413_v58, 4 }
 0x11d   :  { %v415_v61 = vadd.f32 %v414_v60, %v413_v58 }
 0x11f   :  { %v416_v62 = vrot.slane %v415_v61, 2 }
 0x121   :  { %v417_v63 = vadd.f32 %v416_v62, %v415_v61 }
 0x123   :  { %v418_v0 = vrot.slane %v417_v63, 1 }
 0x125   :  { %v419_v1 = vadd.f32 %v418_v0, %v417_v63  ;;  %v613_v0 = vpop.permute.xlu1 %612 }
 0x127   :  { %v420_v2 = vmax.f32 %v419_v1, 1e-30 }
 0x129   :  { %771 = vrsqrt.f32 %v420_v2 }
 0x136   :  { %v772_v3 = vpop.eup %771 }
 0x137   :  { %v422_v4 = vmul.f32 %v772_v3, %v420_v2  ;;  %v636_v2 = vpop.permute.xlu1 %635 }
 0x139   :  { %773 = vtanh.f32 %v422_v4 }
 0x146   :  { %v774_v7 = vpop.eup %773 }
 0x147   :  { %v424_v8 = vmin.f32 %v774_v7, 0.996 }
 0x149   :  { %v425_v9 = vmul.f32 %v772_v3, %v424_v8 }
 0x14b   :  { %v433_v10 = vmul.f32 %v425_v9, %v398_v50  ;;  %v432_v11 = vmul.f32 %v425_v9, %v397_v46  ;;  %v431_v12 = vmul.f32 %v425_v9, %v396_v42  ;;  %v430_v14 = vmul.f32 %v425_v9, %v395_v39 }
 0x14c   :  { %v429_v15 = vmul.f32 %v425_v9, %v394_v35  ;;  %v428_v16 = vmul.f32 %v425_v9, %v393_v13  ;;  %v427_v17 = vmul.f32 %v425_v9, %v392_v18  ;;  %v426_v19 = vmul.f32 %v425_v9, %v1030_v31  ;;  %v455_v18 = vpop.permute.xlu0 %454 }
 0x14d   :  { %744 = vmatprep.subr.mxu1 %v433_v10 }
 0x14e   :  { %745 = vmatpush3.msra.mxu1 %v433_v10 }
 0x14f   :  { %746 = vmatprep.subr.mxu1 %v432_v11 }
 0x150   :  { %747 = vmatpush3.msra.mxu1 %v432_v11  ;;  %v608_v63 = vpop.permute.xlu0 %607  ;;  %v623_v11 = vpop.permute.xlu1 %622 }
 0x151   :  { %748 = vmatprep.subr.mxu1 %v431_v12 }
 0x152   :  { %749 = vmatpush3.msra.mxu1 %v431_v12 }
 0x153   :  { %750 = vmatprep.subr.mxu1 %v430_v14 }
 0x154   :  { %751 = vmatpush3.msra.mxu1 %v430_v14  ;;  %v618_v1 = vpop.permute.xlu0 %617 }
 0x155   :  { %752 = vmatprep.subr.mxu1 %v429_v15 }
 0x156   :  { %753 = vmatpush3.msra.mxu1 %v429_v15 }
 0x157   :  { %754 = vmatprep.subr.mxu1 %v428_v16 }
 0x158   :  { %755 = vmatpush3.msra.mxu1 %v428_v16  ;;  %v641_v3 = vpop.permute.xlu0 %640 }
 0x159   :  { %756 = vmatprep.subr.mxu1 %v427_v17 }
 0x15a   :  { %757 = vmatpush3.msra.mxu1 %v427_v17 }
 0x15b   :  { %758 = vmatprep.subr.mxu1 %v426_v19 }
 0x15c   :  { %759 = vmatpush3.msra.mxu1 %v426_v19 }
 0x15d   :  { %761 = vmatmul.mubr.msk.f32.vlgmr.msra.gmra.mxu1 %vm462_vm1, %v435_v20 }
 0x15e   :  { %763 = vmatprep.mubr.msk.f32.mxu1 %vm462_vm1, %v436_v21 }
 0x161   :  { %764 = vmatmul.mubr.msk.f32.gmra.mxu1 %vm462_vm1, %v437_v22  ;;  %v646_v22 = vpop.permute.xlu0 %645 }
 0x21d   :  { %v762_v59 = vpop.f32.mrf.mxu1 }
 0x21e   :  { %v547_v25 = vadd.f32 %v762_v59, %v450_v23 }
 0x21f   :  { %v541_v57 = vpop.f32.mrf.mxu1 }
 0x220   :  { %v542_v26 = vadd.f32 %v541_v57, %v445_v24  ;;  %v561_v28 = vmax.f32 %v547_v25, 0.0  ;;  %v651_v25 = vpop.permute.xlu1 %650 }
 0x221   :  { %v765_v27 = vpop.f32.mrf.mxu1 }
 0x222   :  { %v560_v5 = vmax.f32 %v542_v26, 0.0  ;;  %v557_v31 = vadd.f32 %v765_v27, %v460_v6  ;;  %v574_v34 = vmul.f32 %v561_v28, %v561_v28 }
 0x223   :  { %v551_v13 = vpop.f32.mrf.mxu1 }
 0x224   :  { %v573_v32 = vmul.f32 %v560_v5, %v560_v5  ;;  %v552_v33 = vadd.f32 %v551_v13, %v455_v18  ;;  %v564_v35 = vadd.f32 %v561_v28, %v560_v5  ;;  %v563_v30 = vmax.f32 %v557_v31, 0.0 }
 0x226   :  { %v562_v36 = vmax.f32 %v552_v33, 0.0  ;;  %v577_v37 = vadd.f32 %v574_v34, %v573_v32  ;;  %v576_v40 = vmul.f32 %v563_v30, %v563_v30 }
 0x228   :  { %v565_v38 = vadd.f32 %v564_v35, %v562_v36  ;;  %v575_v39 = vmul.f32 %v562_v36, %v562_v36 }
 0x22a   :  { %v566_v41 = vadd.f32 %v565_v38, %v563_v30  ;;  %v578_v29 = vadd.f32 %v577_v37, %v575_v39 }
 0x22c   :  { %v567_v42 = vrot.slane %v566_v41, 4  ;;  %v579_v43 = vadd.f32 %v578_v29, %v576_v40 }
 0x22e   :  { %v568_v44 = vadd.f32 %v567_v42, %v566_v41  ;;  %v580_v45 = vrot.slane %v579_v43, 4 }
 0x230   :  { %v569_v46 = vrot.slane %v568_v44, 2  ;;  %v581_v47 = vadd.f32 %v580_v45, %v579_v43 }
 0x232   :  { %v570_v48 = vadd.f32 %v569_v46, %v568_v44  ;;  %v582_v49 = vrot.slane %v581_v47, 2 }
 0x234   :  { %v571_v50 = vrot.slane %v570_v48, 1  ;;  %v583_v51 = vadd.f32 %v582_v49, %v581_v47 }
 0x236   :  { %v572_v52 = vadd.f32 %v571_v50, %v570_v48  ;;  %v584_v53 = vrot.slane %v583_v51, 1 }
 0x238   :  { %v585_v54 = vadd.f32 %v584_v53, %v583_v51  ;;  %v586_v55 = vmul.f32 0.03125, %v572_v52 }
 0x23a   :  { %v587_v56 = vmul.f32 0.03125, %v585_v54  ;;  %v588_v58 = vmul.f32 %v586_v55, %v586_v55  ;;  %v591_v4 = vsub.f32 %v560_v5, %v586_v55  ;;  %v592_v7 = vsub.f32 %v561_v28, %v586_v55 }
 0x23b   :  { %v593_v8 = vsub.f32 %v562_v36, %v586_v55  ;;  %v594_v9 = vsub.f32 %v563_v30, %v586_v55 }
 0x23c   :  { %v589_v60 = vsub.f32 %v587_v56, %v588_v58 }
 0x23e   :  { %v590_v61 = vmax.f32 %v589_v60, 0.0 }
 0x240   :  { %v595_v62 = vadd.f32 1e-05, %v590_v61 }
 0x242   :  { %775 = vrsqrt.f32 %v595_v62 }
 0x24f   :  { %v776_v10 = vpop.eup %775 }
 0x250   :  { %v597_v12 = vmul.f32 %v776_v10, %v591_v4  ;;  %v598_v14 = vmul.f32 %v776_v10, %v592_v7  ;;  %v599_v15 = vmul.f32 %v776_v10, %v593_v8  ;;  %v600_v16 = vmul.f32 %v776_v10, %v594_v9 }
 0x252   :  { %v625_v17 = vmul.f32 %v608_v63, %v597_v12  ;;  %v626_v19 = vmul.f32 %v613_v0, %v598_v14  ;;  %v627_v20 = vmul.f32 %v618_v1, %v599_v15  ;;  %v628_v21 = vmul.f32 %v623_v11, %v600_v16 }
 0x254   :  { %v653_v23 = vadd.f32 %v636_v2, %v625_v17  ;;  %v654_v24 = vadd.f32 %v641_v3, %v626_v19  ;;  %v655_v59 = vadd.f32 %v646_v22, %v627_v20  ;;  %v656_v57 = vadd.f32 %v651_v25, %v628_v21 }
 0x256   :  { %v657_v26 = vmul.f32 %v653_v23, %v653_v23  ;;  %v658_v6 = vmul.f32 %v654_v24, %v654_v24  ;;  %v659_v27 = vmul.f32 %v655_v59, %v655_v59  ;;  %v660_v5 = vmul.f32 %v656_v57, %v656_v57 }
 0x258   :  { %v661_v28 = vadd.f32 %v658_v6, %v657_v26 }
 0x25a   :  { %v662_v31 = vadd.f32 %v661_v28, %v659_v27 }
 0x25c   :  { %v663_v18 = vadd.f32 %v662_v31, %v660_v5 }
 0x25e   :  { %v664_v13 = vrot.slane %v663_v18, 4 }
 0x260   :  { %v665_v32 = vadd.f32 %v664_v13, %v663_v18 }
 0x262   :  { %v666_v33 = vrot.slane %v665_v32, 2 }
 0x264   :  { %v667_v34 = vadd.f32 %v666_v33, %v665_v32 }
 0x266   :  { %v668_v35 = vrot.slane %v667_v34, 1 }
 0x268   :  { %v669_v30 = vadd.f32 %v668_v35, %v667_v34 }
 0x26a   :  { %v670_v36 = vmax.f32 %v669_v30, 1e-30 }
 0x26c   :  { %777 = vrsqrt.f32 %v670_v36 }
 0x279   :  { %v778_v37 = vpop.eup %777 }
 0x27a   :  { %v672_v38 = vmul.f32 %v778_v37, %v670_v36 }
 0x27c   :  { %779 = vtanh.f32 %v672_v38 }
 0x289   :  { %v780_v39 = vpop.eup %779 }
 0x28a   :  { %v674_v40 = vmin.f32 %v780_v39, 0.996 }
 0x28c   :  { %v675_v41 = vmul.f32 %v778_v37, %v674_v40 }
 0x28e   :  { %v676_v29 = vmul.f32 %v675_v41, %v653_v23  ;;  %v677_v42 = vmul.f32 %v675_v41, %v654_v24  ;;  %v678_v43 = vmul.f32 %v675_v41, %v655_v59  ;;  %v679_v44 = vmul.f32 %v675_v41, %v656_v57 }
 0x290   :  { %680 = vst [vmem:[%s1068_s9] sm:$0xff] %v676_v29  ;;  %681 = vst [vmem:[%s1068_s9 + $0x8] sm:$0xff] %v677_v42 }
 0x291   :  { %682 = vst [vmem:[%s1068_s9 + $0x10] sm:$0xff] %v678_v43  ;;  %683 = vst [vmem:[%s1068_s9 + $0x18] sm:$0xff] %v679_v44 }

</bundles_post_ra>
